<compile_context>
chip_gen: v5e
topology: v5e:2x2
jax: 0.10.0
libtpu: 0.0.40
codegen_flags: <defaults>
</compile_context>

<pallas_src>
import functools

import jax
import jax.numpy as jnp
from jax import lax
from jax.experimental import pallas as pl
from jax.experimental.pallas import tpu as pltpu

SLOPE = 1.0
_TARGET_TILE_BYTES = 2 * 1024 * 1024  # per input buffer (x2 for double-buffering)


def _penalty_kernel(x_ref, o_ref, acc_ref, *, D, pack, slope):
    """x_ref: (tb, tn, pack*D); o_ref: (tb, 1); acc_ref: VMEM (tb, 1) f32."""
    n_idx = pl.program_id(1)

    @pl.when(n_idx == 0)
    def _init():
        acc_ref[...] = jnp.zeros_like(acc_ref)

    x = x_ref[...].astype(jnp.float32)            # accumulate in f32
    tb, tn, PD = x.shape

    # |x[..., 1]| fix: feature index 1 of each packed row sits at lane p*D + 1.
    lane = lax.broadcasted_iota(jnp.int32, (1, 1, PD), 2)
    feat1 = lane == 1
    for p in range(1, pack):
        feat1 = feat1 | (lane == p * D + 1)
    x_adj = jnp.where(feat1, jnp.abs(x), x)       # (1,1,PD) mask broadcasts

    if pack > 1:
        # Per-original-row sums via a tiny block-diagonal matmul (MXU is idle).
        r = lax.broadcasted_iota(jnp.int32, (PD, pack), 0)
        c = lax.broadcasted_iota(jnp.int32, (PD, pack), 1)
        seg = ((r >= c * D) & (r < (c + 1) * D)).astype(jnp.float32)
        sigma = jnp.dot(x_adj.reshape(tb * tn, PD), seg,
                        preferred_element_type=jnp.float32)
        sigma = sigma.reshape(tb, tn, pack)                    # (tb, tn, pack)
    else:
        sigma = jnp.sum(x_adj, axis=-1, keepdims=True)         # (tb, tn, 1)

    penalty = jnp.where(sigma > 40.0, slope * sigma, 0.0)
    row_pen = jnp.sum(penalty, axis=-1)                        # (tb, tn)
    acc_ref[...] += jnp.sum(row_pen, axis=-1, keepdims=True)   # (tb, 1)

    @pl.when(n_idx == pl.num_programs(1) - 1)
    def _finalize():
        o_ref[...] = acc_ref[...].astype(o_ref.dtype)


def _pick_row_tile(n_rows, row_bytes, target_bytes=_TARGET_TILE_BYTES):
    """Largest row-tile that divides n_rows, is a multiple of 8 (or the full
    axis), and keeps the tile at/under ~target_bytes."""
    max_rows = max(1, target_bytes // max(1, row_bytes))
    if n_rows <= max_rows:
        return n_rows
    t = (min(n_rows, max_rows) // 8) * 8
    while t >= 8:
        if n_rows % t == 0:
            return t
        t -= 8
    return n_rows  # no clean multiple-of-8 divisor: fall back to full axis


def penalty_module(x, slope=SLOPE):
    """x: (B, N, D) -> (B,) float32, matching PenaltyModule.forward."""
    B, N, D = x.shape

    # Pack consecutive rows so the lane (last) dim is a dense 128 when D < 128.
    if D < 128 and 128 % D == 0 and N % (128 // D) == 0:
        pack = 128 // D
    else:
        pack = 1
    Np = N // pack
    PD = D * pack
    xp = x.reshape(B, Np, PD)

    # Batch tile: output block needs tb % 8 == 0 or tb == B.
    tb = 8 if (B > 8 and B % 8 == 0) else B
    tn = _pick_row_tile(Np, tb * PD * x.dtype.itemsize)

    grid = (B // tb, Np // tn)
    kernel = functools.partial(_penalty_kernel, D=D, pack=pack, slope=float(slope))

    out = pl.pallas_call(
        kernel,
        out_shape=jax.ShapeDtypeStruct((B, 1), jnp.float32),
        grid_spec=pltpu.PrefetchScalarGridSpec(
            num_scalar_prefetch=0,
            grid=grid,
            in_specs=[pl.BlockSpec((tb, tn, PD), lambda bi, ni: (bi, ni, 0))],
            out_specs=pl.BlockSpec((tb, 1), lambda bi, ni: (bi, 0)),
            scratch_shapes=[pltpu.VMEM((tb, 1), jnp.float32)],
        ),
        compiler_params=pltpu.CompilerParams(
            dimension_semantics=("parallel", "arbitrary")),
    )(xp)
    return out[:, 0]


def penalty_ref(x, slope=SLOPE):
    """Pure-JAX reference mirroring the PyTorch forward."""
    x_copy = x.at[..., 1].set(jnp.abs(x[..., 1]))
    sigma = x_copy.sum(axis=-1)
    penalty = slope * sigma
    penalty = jnp.where(sigma <= 40.0, 0.0, penalty)
    return penalty.sum(axis=-1)


if __name__ == "__main__":
    key = jax.random.PRNGKey(0)
    B, N, D = 2, 8, 32
    # Scale so some row-sums exceed the 40 threshold and some do not.
    x = jax.random.normal(key, (B, N, D), dtype=jnp.float32) * 12.0

    out = jax.block_until_ready(penalty_module(x))
    ref = jax.block_until_ready(penalty_ref(x))

    assert out.shape == (B,), out.shape
    assert jnp.allclose(out, ref, atol=1e-4, rtol=1e-4), (out, ref)
    print("KERNEL_OK")
</pallas_src>

<mosaic_0001>
module attributes {stable_mosaic.version = 11 : i64} {
  func.func @_penalty_kernel(%arg0: i32, %arg1: i32, %arg2: memref<2x2x128xf32, #tpu.memory_space<vmem>>, %arg3: memref<2x1xf32, #tpu.memory_space<vmem>>, %arg4: memref<2x1xf32, #tpu.memory_space<vmem>>) attributes {dimension_semantics = [#tpu.dimension_semantics<parallel>, #tpu.dimension_semantics<arbitrary>], iteration_bounds = array<i64: 1, 1>, scalar_prefetch = 0 : i64, scratch_operands = 1 : i64, tpu.core_type = #tpu.core_type<tc>, window_params = [{transform_indices = @transform_0, window_bounds = array<i64: 2, 2, 128>}, {transform_indices = @transform_1, window_bounds = array<i64: 2, 1>}]} {
    %c0_i32 = arith.constant 0 : i32
    %0 = arith.cmpi eq, %arg1, %c0_i32 : i32
    %1 = arith.extui %0 : i1 to i32
    %c0_i32_0 = arith.constant 0 : i32
    %2 = arith.cmpi ne, %1, %c0_i32_0 : i32
    scf.if %2 {
      %cst_16 = arith.constant 0.000000e+00 : f32
      %51 = vector.broadcast %cst_16 : f32 to vector<2x1xf32>
      %c0_17 = arith.constant 0 : index
      %c0_18 = arith.constant 0 : index
      %52 = vector.load %arg4[%c0_17, %c0_18] : memref<2x1xf32, #tpu.memory_space<vmem>>, vector<2x1xf32>
      tpu.vector_store %arg4[%c0_17, %c0_18], %51 {strides = array<i32>} : memref<2x1xf32, #tpu.memory_space<vmem>>, vector<2x1xf32>,
    } else {
    }
    %c0 = arith.constant 0 : index
    %c0_1 = arith.constant 0 : index
    %c0_2 = arith.constant 0 : index
    %3 = vector.load %arg2[%c0, %c0_1, %c0_2] : memref<2x2x128xf32, #tpu.memory_space<vmem>>, vector<2x2x128xf32>
    %4 = tpu.iota {dimensions = array<i32: 2>} : vector<1x1x128xi32>
    %c1_i32 = arith.constant 1 : i32
    %5 = vector.broadcast %c1_i32 : i32 to vector<1x1x128xi32>
    %6 = arith.cmpi eq, %4, %5 : vector<1x1x128xi32>
    %c33_i32 = arith.constant 33 : i32
    %7 = vector.broadcast %c33_i32 : i32 to vector<1x1x128xi32>
    %8 = arith.cmpi eq, %4, %7 : vector<1x1x128xi32>
    %9 = arith.ori %6, %8 : vector<1x1x128xi1>
    %c65_i32 = arith.constant 65 : i32
    %10 = vector.broadcast %c65_i32 : i32 to vector<1x1x128xi32>
    %11 = arith.cmpi eq, %4, %10 : vector<1x1x128xi32>
    %12 = arith.ori %9, %11 : vector<1x1x128xi1>
    %c97_i32 = arith.constant 97 : i32
    %13 = vector.broadcast %c97_i32 : i32 to vector<1x1x128xi32>
    %14 = arith.cmpi eq, %4, %13 : vector<1x1x128xi32>
    %15 = arith.ori %12, %14 : vector<1x1x128xi1>
    %16 = math.absf %3 : vector<2x2x128xf32>
    %17 = vector.shape_cast %15 : vector<1x1x128xi1> to vector<1x1x128xi1>
    %18 = vector.broadcast %17 : vector<1x1x128xi1> to vector<2x2x128xi1>
    %19 = arith.select %18, %16, %3 : vector<2x2x128xi1>, vector<2x2x128xf32>
    %20 = tpu.iota {dimensions = array<i32: 0>} : vector<128x4xi32>
    %21 = tpu.iota {dimensions = array<i32: 1>} : vector<128x4xi32>
    %c32_i32 = arith.constant 32 : i32
    %22 = vector.broadcast %c32_i32 : i32 to vector<128x4xi32>
    %23 = arith.muli %21, %22 : vector<128x4xi32>
    %24 = arith.cmpi sge, %20, %23 : vector<128x4xi32>
    %c1_i32_3 = arith.constant 1 : i32
    %25 = vector.broadcast %c1_i32_3 : i32 to vector<128x4xi32>
    %26 = arith.addi %21, %25 : vector<128x4xi32>
    %c32_i32_4 = arith.constant 32 : i32
    %27 = vector.broadcast %c32_i32_4 : i32 to vector<128x4xi32>
    %28 = arith.muli %26, %27 : vector<128x4xi32>
    %29 = arith.cmpi slt, %20, %28 : vector<128x4xi32>
    %30 = arith.andi %24, %29 : vector<128x4xi1>
    %31 = arith.extui %30 : vector<128x4xi1> to vector<128x4xi32>
    %32 = arith.sitofp %31 : vector<128x4xi32> to vector<128x4xf32>
    %33 = vector.shape_cast %19 : vector<2x2x128xf32> to vector<4x128xf32>
    %cst = arith.constant dense<0.000000e+00> : vector<4x4xf32>
    %34 = tpu.matmul %33, %32, %cst {dimension_numbers = #tpu.dot_dimension_numbers<[1], [0], [0], [1], [0, 0, 1, 1], [], []>} : vector<4x128xf32>, vector<128x4xf32>, vector<4x4xf32> -> vector<4x4xf32>
    %35 = vector.shape_cast %34 : vector<4x4xf32> to vector<2x2x4xf32>
    %cst_5 = arith.constant 4.000000e+01 : f32
    %36 = vector.broadcast %cst_5 : f32 to vector<2x2x4xf32>
    %37 = arith.cmpf ogt, %35, %36 : vector<2x2x4xf32>
    %cst_6 = arith.constant 1.000000e+00 : f32
    %38 = vector.broadcast %cst_6 : f32 to vector<2x2x4xf32>
    %39 = arith.mulf %38, %35 : vector<2x2x4xf32>
    %cst_7 = arith.constant 0.000000e+00 : f32
    %40 = vector.broadcast %cst_7 : f32 to vector<2x2x4xf32>
    %41 = arith.select %37, %39, %40 : vector<2x2x4xi1>, vector<2x2x4xf32>
    %cst_8 = arith.constant dense<0.000000e+00> : vector<2x2xf32>
    %42 = vector.multi_reduction <add>, %41, %cst_8 [2] : vector<2x2x4xf32> to vector<2x2xf32>
    %c0_9 = arith.constant 0 : index
    %c0_10 = arith.constant 0 : index
    %43 = vector.load %arg4[%c0_9, %c0_10] : memref<2x1xf32, #tpu.memory_space<vmem>>, vector<2x1xf32>
    %cst_11 = arith.constant dense<0.000000e+00> : vector<2xf32>
    %44 = vector.multi_reduction <add>, %42, %cst_11 [1] : vector<2x2xf32> to vector<2xf32>
    %45 = vector.shape_cast %44 : vector<2xf32> to vector<2x1xf32>
    %46 = arith.addf %43, %45 : vector<2x1xf32>
    %c0_12 = arith.constant 0 : index
    %c0_13 = arith.constant 0 : index
    %47 = vector.load %arg4[%c0_12, %c0_13] : memref<2x1xf32, #tpu.memory_space<vmem>>, vector<2x1xf32>
    tpu.vector_store %arg4[%c0_12, %c0_13], %46 {strides = array<i32>} : memref<2x1xf32, #tpu.memory_space<vmem>>, vector<2x1xf32>,
    %c0_i32_14 = arith.constant 0 : i32
    %48 = arith.cmpi eq, %arg1, %c0_i32_14 : i32
    %49 = arith.extui %48 : i1 to i32
    %c0_i32_15 = arith.constant 0 : i32
    %50 = arith.cmpi ne, %49, %c0_i32_15 : i32
    scf.if %50 {
      %c0_16 = arith.constant 0 : index
      %c0_17 = arith.constant 0 : index
      %51 = vector.load %arg4[%c0_16, %c0_17] : memref<2x1xf32, #tpu.memory_space<vmem>>, vector<2x1xf32>
      %c0_18 = arith.constant 0 : index
      %c0_19 = arith.constant 0 : index
      %52 = vector.load %arg3[%c0_18, %c0_19] : memref<2x1xf32, #tpu.memory_space<vmem>>, vector<2x1xf32>
      tpu.vector_store %arg3[%c0_18, %c0_19], %51 {strides = array<i32>} : memref<2x1xf32, #tpu.memory_space<vmem>>, vector<2x1xf32>,
    } else {
    }
    return
  }
  func.func @transform_0(%arg0: i32, %arg1: i32) -> (i32, i32, i32) {
    %c0_i32 = arith.constant 0 : i32
    %c0_i32_0 = arith.constant 0 : i32
    return %arg0, %arg1, %c0_i32 : i32, i32, i32
  }
  func.func @transform_1(%arg0: i32, %arg1: i32) -> (i32, i32) {
    %c0_i32 = arith.constant 0 : i32
    %c0_i32_0 = arith.constant 0 : i32
    return %arg0, %c0_i32 : i32, i32
  }
}

</mosaic_0001>

<bundles_post_ra>
// kernel: tpu_custom_call.1
= control target key start
LH: loop header
LB: loop body
LE: loop exit
PB: predicated region body
PF: predicated region fallthrough
CT: control target
= control target key end

     0   :  { %6 = vsyncpa [#allocation4], 0  ;;  %s276_s9 = smov [#allocation3]   ;;  %s277_s11 = smov 32   ;;  %v32_v0 = vlaneseq  ;;  %s393_s0 = inlined_call_operand.hbm [shape: f32[2,2,128], index: 0, kind: input, shape index: {}]   ;;  %s394_s1 = inlined_call_operand.vmem [shape: f32[2,1], index: 1, kind: output, shape index: {}]  }
   0x1   :  { %s11_s8 = sshll.u32 %s393_s0, 4  ;;  %s13_s10 = sshll.u32 %s276_s9, 4  ;;  %s12_s8 = int_to_ptr.hbm [resolvable:$true] %s11_s8  ;;  %s14_s10 = int_to_ptr.vmem [resolvable:$true] %s13_s10 }
   0x2   :  { %s278_s12 = smov 2  }
   0x3   :  { %19 = dma.hbm_to_vmem [thread:$0]  %s12_s8, 64, %s14_s10, [#allocation4], %s277_s11, %s277_s11, %s278_s12  }
   0x4   :  { %274 = dma.done.wait [#allocation4], 64  }
   0x5   :  { %275 = vsyncadd [#allocation4], 4294967232  ;;  %v294_v1 = vand.u32 127, %v32_v0  ;;  %v296_v2 = vshrl.u32 %v32_v0, 7  ;;  %v279_v12 = vmov 1.0   ;;  %v280_v37 = vmov 0.0  }
   0x6   :  { %v30_v13 = vld [vmem:[#allocation3] sm:$0x3]  ;;  %v31_v14 = vld [vmem:[#allocation3 + $0x2] sm:$0x3] }
   0x7   :  { %v63_v3 = vadd.s32 120, %v296_v2  ;;  %v300_v4 = vmul.u32 32, %v294_v1  ;;  %v81_v5 = vadd.s32 1, %v294_v1  ;;  %v62_v6 = vadd.s32 112, %v296_v2 }
   0x8   :  { %v61_v7 = vadd.s32 104, %v296_v2  ;;  %v60_v8 = vadd.s32 96, %v296_v2  ;;  %v59_v10 = vadd.s32 88, %v296_v2  ;;  %v58_v11 = vadd.s32 80, %v296_v2 }
   0x9   :  { %vm80_vm0 = vcmp.ge.s32.totalorder %v63_v3, %v300_v4  ;;  %v307_v9 = vmul.u32 32, %v81_v5  ;;  %vm79_vm1 = vcmp.ge.s32.totalorder %v62_v6, %v300_v4  ;;  %v57_v15 = vadd.s32 72, %v296_v2 }
   0xa   :  { %vm78_vm4 = vcmp.ge.s32.totalorder %v61_v7, %v300_v4  ;;  %vm77_vm7 = vcmp.ge.s32.totalorder %v60_v8, %v300_v4  ;;  %vm76_vm10 = vcmp.ge.s32.totalorder %v59_v10, %v300_v4  ;;  %vm75_vm13 = vcmp.ge.s32.totalorder %v58_v11, %v300_v4 }
   0xb   :  { %vm98_vm2 = vcmp.lt.s32.totalorder %v63_v3, %v307_v9  ;;  %vm97_vm3 = vcmp.lt.s32.totalorder %v62_v6, %v307_v9  ;;  %vm96_vm5 = vcmp.lt.s32.totalorder %v61_v7, %v307_v9  ;;  %vm95_vm8 = vcmp.lt.s32.totalorder %v60_v8, %v307_v9 }
   0xc   :  { %vm114_vm6 = vmand %vm80_vm0, %vm98_vm2  ;;  %vm94_vm11 = vcmp.lt.s32.totalorder %v59_v10, %v307_v9  ;;  %vm93_vm14 = vcmp.lt.s32.totalorder %v58_v11, %v307_v9  ;;  %vm34_vm0 = vcmp.eq.s32.totalorder %v294_v1, 1  ;;  %vm35_vm2 = vcmp.eq.s32.totalorder %v294_v1, 33 }
   0xd   :  { %229 = vmatpush.msk.msra.mxu0 %vm114_vm6, %v279_v12  ;;  %vm113_vm9 = vmand %vm79_vm1, %vm97_vm3  ;;  %vm37_vm3 = vcmp.eq.s32.totalorder %v294_v1, 65  ;;  %v41_v18 = vand.u32 2147483647, %v30_v13  ;;  %v42_v19 = vand.u32 2147483647, %v31_v14  ;;  %v56_v20 = vadd.s32 64, %v296_v2 }
   0xe   :  { %vm112_vm12 = vmand %vm78_vm4, %vm96_vm5  ;;  %vm39_vm5 = vcmp.eq.s32.totalorder %v294_v1, 97  ;;  %v55_v21 = vadd.s32 56, %v296_v2  ;;  %v54_v22 = vadd.s32 48, %v296_v2  ;;  %v53_v25 = vadd.s32 40, %v296_v2 }
   0xf   :  { %230 = vmatpush.msk.msra.mxu0 %vm113_vm9, %v279_v12  ;;  %vm111_vm15 = vmand %vm77_vm7, %vm95_vm8  ;;  %vm74_vm8 = vcmp.ge.s32.totalorder %v57_v15, %v300_v4  ;;  %vm92_vm9 = vcmp.lt.s32.totalorder %v57_v15, %v307_v9  ;;  %v52_v26 = vadd.s32 32, %v296_v2  ;;  %v51_v27 = vadd.s32 24, %v296_v2 }
  0x10   :  { %vm327_vm1 = vmand %vm76_vm10, %vm94_vm11  ;;  %vm73_vm11 = vcmp.ge.s32.totalorder %v56_v20, %v300_v4  ;;  %v50_v28 = vadd.s32 16, %v296_v2  ;;  %v49_v29 = vadd.s32 8, %v296_v2 }
  0x11   :  { %231 = vmatpush.msk.msra.mxu0 %vm112_vm12, %v279_v12  ;;  %vm333_vm4 = vmand %vm75_vm13, %vm93_vm14  ;;  %vm91_vm12 = vcmp.lt.s32.totalorder %v56_v20, %v307_v9  ;;  %vm72_vm14 = vcmp.ge.s32.totalorder %v55_v21, %v300_v4 }
  0x12   :  { %vm36_vm6 = vmor %vm34_vm0, %vm35_vm2  ;;  %vm71_vm2 = vcmp.ge.s32.totalorder %v54_v22, %v300_v4 }
  0x13   :  { %232 = vmatpush.msk.msra.mxu0 %vm111_vm15, %v279_v12  ;;  %vm38_vm7 = vmor %vm36_vm6, %vm37_vm3  ;;  %vm90_vm15 = vcmp.lt.s32.totalorder %v55_v21, %v307_v9 }
  0x14   :  { %vm40_vm10 = vmor %vm38_vm7, %vm39_vm5  ;;  %vm88_vm5 = vcmp.lt.s32.totalorder %v53_v25, %v307_v9  ;;  %vm69_vm7 = vcmp.ge.s32.totalorder %v52_v26, %v300_v4 }
  0x15   :  { %233 = vmatpush.msk.msra.mxu0 %vm327_vm1, %v279_v12  ;;  %v45_v23 = vsel %vm40_vm10, %v41_v18, %v30_v13  ;;  %v46_v24 = vsel %vm40_vm10, %v42_v19, %v31_v14  ;;  %vm108_vm13 = vmand %vm74_vm8, %vm92_vm9  ;;  %vm89_vm1 = vcmp.lt.s32.totalorder %v54_v22, %v307_v9  ;;  %vm87_vm8 = vcmp.lt.s32.totalorder %v52_v26, %v307_v9 }
  0x16   :  { %149 = vst [vmem:[#allocation1] ss:$4 sm:$0xff] %v45_v23  ;;  %vm107_vm0 = vmand %vm73_vm11, %vm91_vm12  ;;  %vm68_vm10 = vcmp.ge.s32.totalorder %v51_v27, %v300_v4  ;;  %vm86_vm11 = vcmp.lt.s32.totalorder %v51_v27, %v307_v9 }
  0x17   :  { %234 = vmatpush.msk.msra.mxu0 %vm333_vm4, %v279_v12  ;;  %151 = vst [vmem:[#allocation1 + $0x1] ss:$4 sm:$0xff] %v46_v24  ;;  %vm106_vm3 = vmand %vm72_vm14, %vm90_vm15  ;;  %vm70_vm4 = vcmp.ge.s32.totalorder %v53_v25, %v300_v4  ;;  %vm85_vm14 = vcmp.lt.s32.totalorder %v50_v28, %v307_v9 }
  0x18   :  { %vm105_vm6 = vmand %vm71_vm2, %vm89_vm1  ;;  %vm84_vm2 = vcmp.lt.s32.totalorder %v49_v29, %v307_v9 }
  0x19   :  { %235 = vmatpush.msk.msra.mxu0 %vm108_vm13, %v279_v12  ;;  %vm104_vm9 = vmand %vm70_vm4, %vm88_vm5  ;;  %vm67_vm13 = vcmp.ge.s32.totalorder %v50_v28, %v300_v4  ;;  %vm83_vm4 = vcmp.lt.s32.totalorder %v296_v2, %v307_v9 }
  0x1a   :  { %vm103_vm12 = vmand %vm69_vm7, %vm87_vm8  ;;  %vm181_vm7 = vcmask 25600  }
  0x1b   :  { %236 = vmatpush.msk.msra.mxu0 %vm107_vm0, %v279_v12  ;;  %vm102_vm15 = vmand %vm68_vm10, %vm86_vm11  ;;  %vm66_vm0 = vcmp.ge.s32.totalorder %v49_v29, %v300_v4  ;;  %vm28_vm10 = vcmask 1024   ;;  %vm193_vm11 = vcmask 1041409  }
  0x1c   :  { %vm101_vm1 = vmand %vm67_vm13, %vm85_vm14  ;;  %29 = vst.msk [vmem:[#allocation2] sm:$0x3] %vm28_vm10, %v280_v37 }
  0x1d   :  { %237 = vmatpush.msk.msra.mxu0 %vm106_vm3, %v279_v12  ;;  %vm65_vm3 = vcmp.ge.s32.totalorder %v296_v2, %v300_v4  ;;  %vm100_vm5 = vmand %vm66_vm0, %vm84_vm2 }
  0x1e   :  { %v152_v30 = vld.sshfl [vmem:[#allocation1] sm:$0xff pattern:$0x73625140] }
  0x1f   :  { %238 = vmatpush.msk.msra.mxu0 %vm105_vm6, %v279_v12  ;;  %vm99_vm6 = vmand %vm65_vm3, %vm83_vm4 }
  0x21   :  { %239 = vmatpush.msk.msra.mxu0 %vm104_vm9, %v279_v12 }
  0x23   :  { %240 = vmatpush.msk.msra.mxu0 %vm103_vm12, %v279_v12  ;;  %vm196_vm12 = vcmask 9216   ;;  %v188_v44 = vld [vmem:[#allocation2] sm:$0x3] }
  0x25   :  { %241 = vmatpush.msk.msra.mxu0 %vm102_vm15, %v279_v12 }
  0x27   :  { %242 = vmatpush.msk.msra.mxu0 %vm101_vm1, %v279_v12 }
  0x29   :  { %243 = vmatpush.msk.msra.mxu0 %vm100_vm5, %v279_v12 }
  0x2b   :  { %244 = vmatpush.msk.msra.mxu0 %vm99_vm6, %v279_v12 }
  0x2c   :  { %170 = vmatmul.f32.vlgmr.msra.gmra.mxu0 %v152_v30 }
  0xa9   :  { %v171_v31 = vpop.f32.mrf.mxu0 }
  0xaa   :  { %v175_v32 = vrot.slane %v171_v31, 2  ;;  %vm177_vm8 = vcmp.gt.f32.partialorder %v171_v31, 40.0 }
  0xab   :  { %v179_v33 = vsel %vm177_vm8, %v171_v31, 0.0 }
  0xac   :  { %v182_v34 = vsel %vm181_vm7, %v179_v33, 0.0  ;;  %vm178_vm9 = vcmp.gt.f32.partialorder %v175_v32, 40.0 }
  0xad   :  { %183 = vadd.xlane.f32.xlu0 %v182_v34  ;;  %v180_v35 = vsel %vm178_vm9, %v175_v32, 0.0 }
  0xae   :  { %v185_v36 = vsel %vm181_vm7, %v180_v35, 0.0 }
  0xb5   :  { %186 = vadd.xlane.f32.xlu0 %v185_v36 }
 0x120   :  { %v184_v38 = vpop.xlane.xlu0 %183 }
 0x121   :  { %v191_v40 = vperm.slane %v184_v38, %v294_v1 }
 0x128   :  { %v187_v39 = vpop.xlane.xlu0 %186 }
 0x129   :  { %v192_v41 = vperm.slane %v187_v39, %v294_v1 }
 0x12b   :  { %v194_v42 = vsel %vm193_vm11, %v192_v41, %v191_v40 }
 0x12c   :  { %v197_v43 = vsel %vm196_vm12, %v194_v42, 0.0 }
 0x12d   :  { %198 = vadd.xlane.f32.xlu1 %v197_v43 }
 0x1a0   :  { %v199_v45 = vpop.xlane.xlu1 %198 }
 0x1a1   :  { %v200_v46 = vadd.f32 %v199_v45, %v188_v44 }
 0x1a3   :  { %202 = vst.msk [vmem:[#allocation2] sm:$0x3] %vm28_vm10, %v200_v46 }
 0x1aa   :  { %v206_v47 = vld [vmem:[#allocation2] sm:$0x3] }
 0x1ab   :  { %207 = vst.msk [vmem:[%s394_s1] sm:$0x3] %vm28_vm10, %v206_v47 }
 0x1ac   :  { %212 = vsyncpa [#allocation4], 1 }

</bundles_post_ra>
